<compile_context>
chip_gen: v6e
topology: v6e:2x2x1
jax: 0.10.0
libtpu: 0.0.40
codegen_flags: <defaults>
</compile_context>

<pallas_src>
import functools

import jax
import jax.numpy as jnp
from jax import lax
from jax.experimental import pallas as pl
from jax.experimental.pallas import tpu as pltpu


def _round_up(a: int, b: int) -> int:
    return (a + b - 1) // b * b


def _mlp_rowtile_kernel(x_ref, w1_ref, b1_ref, w2_ref, b2_ref, o_ref,
                        *, chunk_rows: int, n_chunks: int):
    """One lane-dense row tile of tokens through Linear->GELU->Linear.

    x_ref/o_ref block: (tile, D).  Weights are whole-array VMEM residents:
      w1: (D, Hp)  b1: (1, Hp)  w2: (Hp, D)  b2: (1, D)
    Hp is a multiple of 128 (zero padded -> numerically exact).
    """
    w1 = w1_ref[...]            # matmul dtype (bf16 by default)
    w2 = w2_ref[...]
    b1 = b1_ref[...]            # f32 (elementwise path stays f32: v5e-friendly)
    b2 = b2_ref[...]

    def chunk_body(c, carry):
        r = pl.multiple_of(c * chunk_rows, chunk_rows)
        x = x_ref[pl.ds(r, chunk_rows), :].astype(w1.dtype)
        h = jnp.dot(x, w1, preferred_element_type=jnp.float32)       # (chunk, Hp) f32
        h = jax.nn.gelu(h + b1, approximate=True)                     # f32 VPU/EUP
        y = jnp.dot(h.astype(w2.dtype), w2,
                    preferred_element_type=jnp.float32)               # (chunk, D) f32
        o_ref[pl.ds(r, chunk_rows), :] = (y + b2).astype(o_ref.dtype)
        return carry

    lax.fori_loop(0, n_chunks, chunk_body, None, unroll=True)


def iter_over_time_mlp(x, w1, b1, w2, b2, *, tile_rows: int = 2048,
                       matmul_dtype=jnp.bfloat16):
    """IterOverTime(MLP) forward: x [B, T, N, D] -> [B, T, N, D].

    Token-wise module => identical to looping over time and stacking outputs
    along dim=1.  matmul_dtype=None keeps matmuls in the input dtype (exact).
    """
    B, T, N, D = x.shape
    H = w1.shape[1]
    rows = B * T * N
    mm_dtype = jnp.dtype(matmul_dtype) if matmul_dtype is not None else jnp.dtype(x.dtype)

    # Lane-dense hidden dim (zero padding of the weights keeps math exact:
    # gelu(0) == 0 and the padded w2 rows are zero).
    Hp = _round_up(H, 128)

    # ---- Row-tile selection -------------------------------------------------
    # Aim for <= tile_rows rows per grid step, but make sure the (parallel)
    # grid has length >= 2 so v7x can shard it across its two TensorCores, and
    # keep last-block waste small (grid = cdiv, no HBM row padding).
    n_tiles = max(2, pl.cdiv(rows, max(tile_rows, 8))) if rows > 8 else 1
    tile = _round_up(pl.cdiv(rows, n_tiles), 8)
    if tile >= 256:
        chunk_rows = 256                      # bound vreg/VMEM live ranges
        tile = _round_up(tile, chunk_rows)
    else:
        chunk_rows = tile
    n_chunks = tile // chunk_rows
    grid = (pl.cdiv(rows, tile),)

    # ---- Operand preparation (weights only; x is fed unpadded) --------------
    x2 = x.reshape(rows, D)                                   # free reshape
    w1p = jnp.pad(w1, ((0, 0), (0, Hp - H))).astype(mm_dtype)  # (D, Hp)
    w2p = jnp.pad(w2, ((0, Hp - H), (0, 0))).astype(mm_dtype)  # (Hp, D)
    b1p = jnp.pad(b1, (0, Hp - H)).reshape(1, Hp).astype(jnp.float32)
    b2p = b2.reshape(1, D).astype(jnp.float32)

    # ---- Cost / VMEM budgeting ----------------------------------------------
    x_size = jnp.dtype(x.dtype).itemsize
    mm_size = jnp.dtype(mm_dtype).itemsize
    cost = pl.CostEstimate(
        flops=4 * rows * D * Hp,                      # two matmuls
        transcendentals=rows * Hp,                    # tanh in GELU
        bytes_accessed=2 * rows * D * x_size + 2 * D * Hp * mm_size + (Hp + D) * 4,
    )
    vmem_bytes = (
        2 * D * Hp * mm_size + (Hp + D) * 4           # resident weights/biases
        + 2 * tile * D * x_size                       # x double buffer
        + 2 * tile * D * x_size                       # out double buffer
        + chunk_rows * (Hp + D) * 4                   # live intermediates
    )
    compiler_kwargs = dict(dimension_semantics=("parallel",))
    if vmem_bytes > 32 * 1024 * 1024:
        # TODO(synk): for very large D/H add a K/N grid axis instead of
        # whole-array weight residency (v7x VMEM is 64 MiB physical).
        compiler_kwargs["vmem_limit_bytes"] = min(int(vmem_bytes * 3 // 2),
                                                  64 * 1024 * 1024)

    # Weights/biases: whole-array, single-buffered, resident in VMEM.
    resident = pl.BlockSpec(memory_space=pltpu.MemorySpace.VMEM)

    kernel = functools.partial(_mlp_rowtile_kernel,
                               chunk_rows=chunk_rows, n_chunks=n_chunks)

    out2 = pl.pallas_call(
        kernel,
        out_shape=jax.ShapeDtypeStruct((rows, D), x.dtype),
        grid_spec=pltpu.PrefetchScalarGridSpec(
            num_scalar_prefetch=0,
            grid=grid,
            in_specs=[
                pl.BlockSpec((tile, D), lambda i: (i, 0)),    # x row tile
                resident,                                     # w1 (D, Hp)
                resident,                                     # b1 (1, Hp)
                resident,                                     # w2 (Hp, D)
                resident,                                     # b2 (1, D)
            ],
            out_specs=pl.BlockSpec((tile, D), lambda i: (i, 0)),
        ),
        compiler_params=pltpu.CompilerParams(**compiler_kwargs),
        cost_estimate=cost,
    )(x2, w1p, b1p, w2p, b2p)

    # Unflatten back to [B, T, N, D] (== stacking per-time-step outputs on dim=1).
    return out2.reshape(B, T, N, D)


def _reference(x, w1, b1, w2, b2, matmul_dtype=None):
    # Pure-JAX reference mirroring the PyTorch module: explicit loop over time.
    md = jnp.dtype(matmul_dtype) if matmul_dtype is not None else jnp.dtype(x.dtype)
    outs = []
    for t in range(x.shape[1]):
        xt = x[:, t]                                              # (B, N, D)
        h = jnp.dot(xt.astype(md), w1.astype(md),
                    preferred_element_type=jnp.float32) + b1
        h = jax.nn.gelu(h, approximate=True)
        y = jnp.dot(h.astype(md), w2.astype(md),
                    preferred_element_type=jnp.float32) + b2
        outs.append(y.astype(x.dtype))
    return jnp.stack(outs, axis=1)


if __name__ == "__main__":
    key = jax.random.PRNGKey(0)

    # Case 1: canonical small shapes (B, T, N, D), hidden H; default bf16 matmuls.
    B, T, N, D, H = 2, 8, 16, 32, 64
    kx, k1, k2, key = jax.random.split(key, 4)
    x = jax.random.normal(kx, (B, T, N, D), dtype=jnp.float32)
    w1 = jax.random.normal(k1, (D, H), dtype=jnp.float32) * 0.05
    b1 = jnp.zeros((H,), dtype=jnp.float32)
    w2 = jax.random.normal(k2, (H, D), dtype=jnp.float32) * 0.05
    b2 = jnp.zeros((D,), dtype=jnp.float32)

    out = jax.block_until_ready(iter_over_time_mlp(x, w1, b1, w2, b2))
    ref = _reference(x, w1, b1, w2, b2, matmul_dtype=jnp.bfloat16)
    assert out.shape == (B, T, N, D)
    assert jnp.allclose(out, ref, atol=5e-3, rtol=5e-3)

    # Case 2: ragged row count (partial last grid block) + non-128-multiple
    # dims + nonzero biases, exact f32 matmul path (tight tolerance).
    B2, T2, N2, D2, H2 = 1, 3, 10, 48, 96
    kx, k1, k2, kb1, kb2, key = jax.random.split(key, 6)
    x_b = jax.random.normal(kx, (B2, T2, N2, D2), dtype=jnp.float32)
    w1_b = jax.random.normal(k1, (D2, H2), dtype=jnp.float32) * 0.05
    b1_b = jax.random.normal(kb1, (H2,), dtype=jnp.float32) * 0.1
    w2_b = jax.random.normal(k2, (H2, D2), dtype=jnp.float32) * 0.05
    b2_b = jax.random.normal(kb2, (D2,), dtype=jnp.float32) * 0.1

    out_b = jax.block_until_ready(
        iter_over_time_mlp(x_b, w1_b, b1_b, w2_b, b2_b, matmul_dtype=None))
    ref_b = _reference(x_b, w1_b, b1_b, w2_b, b2_b)
    assert out_b.shape == (B2, T2, N2, D2)
    assert jnp.allclose(out_b, ref_b, atol=1e-4, rtol=1e-4)

    print("KERNEL_OK")
</pallas_src>

<mosaic_0001>
module attributes {stable_mosaic.version = 11 : i64} {
  func.func @_mlp_rowtile_kernel(%arg0: i32, %arg1: memref<128x32xf32, #tpu.memory_space<vmem>>, %arg2: memref<32x128xbf16, #tpu.memory_space<vmem>>, %arg3: memref<1x128xf32, #tpu.memory_space<vmem>>, %arg4: memref<128x32xbf16, #tpu.memory_space<vmem>>, %arg5: memref<1x32xf32, #tpu.memory_space<vmem>>, %arg6: memref<128x32xf32, #tpu.memory_space<vmem>>) attributes {dimension_semantics = [#tpu.dimension_semantics<parallel>], iteration_bounds = array<i64: 2>, scalar_prefetch = 0 : i64, scratch_operands = 0 : i64, tpu.core_type = #tpu.core_type<tc>, window_params = [{transform_indices = @transform_0, window_bounds = array<i64: 128, 32>}, {pipeline_mode = #tpu.pipeline_mode<synchronous>, transform_indices = @transform_1, window_bounds = array<i64: 32, 128>}, {pipeline_mode = #tpu.pipeline_mode<synchronous>, transform_indices = @transform_2, window_bounds = array<i64: 1, 128>}, {pipeline_mode = #tpu.pipeline_mode<synchronous>, transform_indices = @transform_3, window_bounds = array<i64: 128, 32>}, {pipeline_mode = #tpu.pipeline_mode<synchronous>, transform_indices = @transform_4, window_bounds = array<i64: 1, 32>}, {transform_indices = @transform_5, window_bounds = array<i64: 128, 32>}]} {
    %c0 = arith.constant 0 : index
    %c0_0 = arith.constant 0 : index
    %0 = vector.load %arg2[%c0, %c0_0] : memref<32x128xbf16, #tpu.memory_space<vmem>>, vector<32x128xbf16>
    %c0_1 = arith.constant 0 : index
    %c0_2 = arith.constant 0 : index
    %1 = vector.load %arg4[%c0_1, %c0_2] : memref<128x32xbf16, #tpu.memory_space<vmem>>, vector<128x32xbf16>
    %c0_3 = arith.constant 0 : index
    %c0_4 = arith.constant 0 : index
    %2 = vector.load %arg3[%c0_3, %c0_4] : memref<1x128xf32, #tpu.memory_space<vmem>>, vector<1x128xf32>
    %c0_5 = arith.constant 0 : index
    %c0_6 = arith.constant 0 : index
    %3 = vector.load %arg5[%c0_5, %c0_6] : memref<1x32xf32, #tpu.memory_space<vmem>>, vector<1x32xf32>
    %c0_i32 = arith.constant 0 : i32
    %c128_i32 = arith.constant 128 : i32
    %4 = arith.muli %c0_i32, %c128_i32 : i32
    %5 = tpu.assume_multiple %4, 128 : i32
    %6 = arith.index_cast %5 : i32 to index
    %c0_7 = arith.constant 0 : index
    %7 = vector.load %arg1[%6, %c0_7] : memref<128x32xf32, #tpu.memory_space<vmem>>, vector<128x32xf32>
    %8 = arith.truncf %7 : vector<128x32xf32> to vector<128x32xbf16>
    %cst = arith.constant dense<0.000000e+00> : vector<128x128xf32>
    %9 = tpu.matmul %8, %0, %cst {dimension_numbers = #tpu.dot_dimension_numbers<[1], [0], [0], [1], [0, 0, 1, 1], [], []>} : vector<128x32xbf16>, vector<32x128xbf16>, vector<128x128xf32> -> vector<128x128xf32>
    %10 = vector.broadcast %2 : vector<1x128xf32> to vector<128x128xf32>
    %11 = arith.addf %9, %10 : vector<128x128xf32>
    %12 = arith.mulf %11, %11 : vector<128x128xf32>
    %13 = arith.mulf %11, %12 : vector<128x128xf32>
    %cst_8 = arith.constant 4.471500e-02 : f32
    %14 = vector.broadcast %cst_8 : f32 to vector<128x128xf32>
    %15 = arith.mulf %14, %13 : vector<128x128xf32>
    %16 = arith.addf %11, %15 : vector<128x128xf32>
    %cst_9 = arith.constant 0.797884583 : f32
    %17 = vector.broadcast %cst_9 : f32 to vector<128x128xf32>
    %18 = arith.mulf %17, %16 : vector<128x128xf32>
    %19 = math.tanh %18 : vector<128x128xf32>
    %cst_10 = arith.constant 1.000000e+00 : f32
    %20 = vector.broadcast %cst_10 : f32 to vector<128x128xf32>
    %21 = arith.addf %20, %19 : vector<128x128xf32>
    %cst_11 = arith.constant 5.000000e-01 : f32
    %22 = vector.broadcast %cst_11 : f32 to vector<128x128xf32>
    %23 = arith.mulf %22, %21 : vector<128x128xf32>
    %24 = arith.mulf %11, %23 : vector<128x128xf32>
    %25 = arith.truncf %24 : vector<128x128xf32> to vector<128x128xbf16>
    %cst_12 = arith.constant dense<0.000000e+00> : vector<128x32xf32>
    %26 = tpu.matmul %25, %1, %cst_12 {dimension_numbers = #tpu.dot_dimension_numbers<[1], [0], [0], [1], [0, 0, 1, 1], [], []>} : vector<128x128xbf16>, vector<128x32xbf16>, vector<128x32xf32> -> vector<128x32xf32>
    %27 = vector.broadcast %3 : vector<1x32xf32> to vector<128x32xf32>
    %28 = arith.addf %26, %27 : vector<128x32xf32>
    %29 = arith.index_cast %5 : i32 to index
    %c0_13 = arith.constant 0 : index
    %30 = vector.load %arg6[%29, %c0_13] : memref<128x32xf32, #tpu.memory_space<vmem>>, vector<128x32xf32>
    tpu.vector_store %arg6[%29, %c0_13], %28 {strides = array<i32>} : memref<128x32xf32, #tpu.memory_space<vmem>>, vector<128x32xf32>,
    %c1_i32 = arith.constant 1 : i32
    return
  }
  func.func @transform_0(%arg0: i32) -> (i32, i32) {
    %c0_i32 = arith.constant 0 : i32
    %c0_i32_0 = arith.constant 0 : i32
    return %arg0, %c0_i32 : i32, i32
  }
  func.func @transform_1(%arg0: i32) -> (i32, i32) {
    %c0_i32 = arith.constant 0 : i32
    %c0_i32_0 = arith.constant 0 : i32
    %c0_i32_1 = arith.constant 0 : i32
    return %c0_i32, %c0_i32_0 : i32, i32
  }
  func.func @transform_2(%arg0: i32) -> (i32, i32) {
    %c0_i32 = arith.constant 0 : i32
    %c0_i32_0 = arith.constant 0 : i32
    %c0_i32_1 = arith.constant 0 : i32
    return %c0_i32, %c0_i32_0 : i32, i32
  }
  func.func @transform_3(%arg0: i32) -> (i32, i32) {
    %c0_i32 = arith.constant 0 : i32
    %c0_i32_0 = arith.constant 0 : i32
    %c0_i32_1 = arith.constant 0 : i32
    return %c0_i32, %c0_i32_0 : i32, i32
  }
  func.func @transform_4(%arg0: i32) -> (i32, i32) {
    %c0_i32 = arith.constant 0 : i32
    %c0_i32_0 = arith.constant 0 : i32
    %c0_i32_1 = arith.constant 0 : i32
    return %c0_i32, %c0_i32_0 : i32, i32
  }
  func.func @transform_5(%arg0: i32) -> (i32, i32) {
    %c0_i32 = arith.constant 0 : i32
    %c0_i32_0 = arith.constant 0 : i32
    return %arg0, %c0_i32 : i32, i32
  }
}

</mosaic_0001>

<bundles_post_ra>
// kernel: tpu_custom_call.1
= control target key start
LH: loop header
LB: loop body
LE: loop exit
PB: predicated region body
PF: predicated region fallthrough
CT: control target
= control target key end

     0   :  { %s1003_s18 = smov 0   ;;  %s1253_s0 = inlined_call_operand.vmem [shape: f32[256,32], index: 0, kind: input, shape index: {}]   ;;  %s1254_s1 = inlined_call_operand.vmem [shape: bf16[32,128], index: 1, kind: input, shape index: {}]   ;;  %s1255_s2 = inlined_call_operand.vmem [shape: f32[1,128], index: 2, kind: input, shape index: {}]   ;;  %s1256_s3 = inlined_call_operand.vmem [shape: bf16[128,32], index: 3, kind: input, shape index: {}]   ;;  %s1257_s4 = inlined_call_operand.vmem [shape: f32[1,32], index: 4, kind: input, shape index: {}]   ;;  %s1258_s5 = inlined_call_operand.vmem [shape: f32[256,32], index: 5, kind: output, shape index: {}]  }
   0x1 LB: > { %s790_s19 = sadd.s32 4294967295, %s971_s18   ;;  %p794_p0 = scmp.ge.s32.totalorder %s971_s18, 1  ;;  %s971_s18 = sphi %s1003_s18, %s15_s18  }
   0x2   : > { %p188_p1 = scmp.lt.s32.totalorder %s971_s18, 3 }
   0x4   : > { %p189_p2 = pnand %p794_p0, %p188_p1 }
   0x5   : > { %s795_s22 = sshll.u32 (!%p189_p2), %s790_s19, 4 }
   0x6   : > { %192 = sbr.rel (%p189_p2) target bundleno = 482 (0x1e2), region = 40  ;;  %p217_p3 = scmp.lt.s32.totalorder (!%p189_p2), %s795_s22, 31 }
   0xb   : > { %v923_v0 = vld [vmem:[%s1254_s1 + $0x8] sm:$0xff]   ;;  %v924_v1 = vld [vmem:[%s1254_s1] sm:$0xff]   ;;  %s1260_s22 = smov (!%p217_p3, %s795_s22), 31  ;;  %vm293_vm0 = vcmask 261120   ;;  %v925_v26 = vld [vmem:[%s1256_s3 + $0x38] sm:$0xff]  }
   0xc   : > { %847 = vmatprep.subr.bf16.mxu0 %v923_v0  ;;  %s796_s25 = sshll.u32 %s1260_s22, 3  ;;  %899 = vmatprep.subr.bf16.mxu1 %v925_v26  ;;  %v926_v27 = vld [vmem:[%s1256_s3 + $0x30] sm:$0xff]   ;;  %v927_v28 = vld [vmem:[%s1256_s3 + $0x28] sm:$0xff]   ;;  %v928_v29 = vld [vmem:[%s1256_s3 + $0x20] sm:$0xff]  }
   0xd   : > { %848 = vmatpush3.bf16.msra.mxu0 %v923_v0  ;;  %s1025_s28 = scalar_lea.vmem %s1253_s0, %s796_s25  ;;  %907 = vmatpush3.bf16.msra.mxu1 %v925_v26  ;;  %v929_v30 = vld [vmem:[%s1256_s3 + $0x18] sm:$0xff]   ;;  %v930_v31 = vld [vmem:[%s1256_s3 + $0x10] sm:$0xff]   ;;  %v931_v32 = vld [vmem:[%s1256_s3 + $0x8] sm:$0xff]   ;;  %s1216_s29 = scalar_lea.vmem %s1258_s5, %s796_s25 }
   0xe   : > { %849 = vmatprep.subr.bf16.mxu0 %v924_v1  ;;  %v251_v2 = vld [vmem:[%s1025_s28] sm:$0xff]  ;;  %v252_v3 = vld [vmem:[%s1025_s28 + $0x8] sm:$0xff]  ;;  %v253_v4 = vld [vmem:[%s1025_s28 + $0x10] sm:$0xff]  ;;  %900 = vmatprep.subr.bf16.mxu1 %v926_v27 }
   0xf   : > { %v267_v5 = vpack.c.bf16 %v252_v3, %v251_v2  ;;  %v254_v6 = vld [vmem:[%s1025_s28 + $0x18] sm:$0xff]  ;;  %v255_v7 = vld [vmem:[%s1025_s28 + $0x20] sm:$0xff]  ;;  %v256_v8 = vld [vmem:[%s1025_s28 + $0x28] sm:$0xff] }
  0x10   : > { %v268_v9 = vpack.c.bf16 %v254_v6, %v253_v4  ;;  %v269_v10 = vpack.c.bf16 %v256_v8, %v255_v7  ;;  %v257_v11 = vld [vmem:[%s1025_s28 + $0x30] sm:$0xff]  ;;  %v258_v12 = vld [vmem:[%s1025_s28 + $0x38] sm:$0xff]  ;;  %v259_v13 = vld [vmem:[%s1025_s28 + $0x40] sm:$0xff] }
  0x11   : > { %850 = vmatpush3.bf16.msra.mxu0 %v924_v1  ;;  %851 = vmatprep.mubr.msk.bf16.mxu0 %vm293_vm0, %v267_v5  ;;  %v260_v14 = vld [vmem:[%s1025_s28 + $0x48] sm:$0xff]  ;;  %v270_v15 = vpack.c.bf16 %v258_v12, %v257_v11  ;;  %v261_v17 = vld [vmem:[%s1025_s28 + $0x50] sm:$0xff]  ;;  %v262_v18 = vld [vmem:[%s1025_s28 + $0x58] sm:$0xff] }
  0x12   : > { %v271_v16 = vpack.c.bf16 %v260_v14, %v259_v13  ;;  %v263_v19 = vld [vmem:[%s1025_s28 + $0x60] sm:$0xff]  ;;  %v264_v20 = vld [vmem:[%s1025_s28 + $0x68] sm:$0xff]  ;;  %v272_v21 = vpack.c.bf16 %v262_v18, %v261_v17  ;;  %v265_v23 = vld [vmem:[%s1025_s28 + $0x70] sm:$0xff]  ;;  %867 = vmatprep.subr.bf16.mxu0 %v925_v26  ;;  %908 = vmatpush3.bf16.msra.mxu1 %v926_v27 }
  0x13   : > { %v273_v22 = vpack.c.bf16 %v264_v20, %v263_v19  ;;  %v266_v24 = vld [vmem:[%s1025_s28 + $0x78] sm:$0xff]  ;;  %901 = vmatprep.subr.bf16.mxu1 %v927_v28  ;;  %v932_v33 = vld [vmem:[%s1256_s3] sm:$0xff]  }
  0x14   : > { %852 = vmatmul.mubr.msk.bf16.vlgmr.msra.gmra.mxu0 %vm293_vm0, %v268_v9  ;;  %v274_v25 = vpack.c.bf16 %v266_v24, %v265_v23  ;;  %v1078_v34 = vld [vmem:[%s1255_s2] ss:$0 sm:$0xff] }
  0x15   : > { %855 = vmatprep.mubr.msk.bf16.mxu0 %vm293_vm0, %v269_v10  ;;  %868 = vmatpush3.bf16.msra.mxu0 %v925_v26 }
  0x16   : > { %869 = vmatprep.subr.bf16.mxu0 %v926_v27  ;;  %909 = vmatpush3.bf16.msra.mxu1 %v927_v28 }
  0x17   : > { %902 = vmatprep.subr.bf16.mxu1 %v928_v29 }
  0x19   : > { %870 = vmatpush3.bf16.msra.mxu0 %v926_v27 }
  0x1a   : > { %871 = vmatprep.subr.bf16.mxu0 %v927_v28  ;;  %910 = vmatpush3.bf16.msra.mxu1 %v928_v29 }
  0x1b   : > { %903 = vmatprep.subr.bf16.mxu1 %v929_v30 }
  0x1c   : > { %856 = vmatmul.mubr.msk.bf16.gmra.mxu0 %vm293_vm0, %v270_v15 }
  0x1d   : > { %859 = vmatprep.mubr.msk.bf16.mxu0 %vm293_vm0, %v271_v16  ;;  %872 = vmatpush3.bf16.msra.mxu0 %v927_v28 }
  0x1e   : > { %873 = vmatprep.subr.bf16.mxu0 %v928_v29  ;;  %911 = vmatpush3.bf16.msra.mxu1 %v929_v30 }
  0x1f   : > { %904 = vmatprep.subr.bf16.mxu1 %v930_v31 }
  0x21   : > { %874 = vmatpush3.bf16.msra.mxu0 %v928_v29 }
  0x22   : > { %875 = vmatprep.subr.bf16.mxu0 %v929_v30  ;;  %912 = vmatpush3.bf16.msra.mxu1 %v930_v31 }
  0x23   : > { %905 = vmatprep.subr.bf16.mxu1 %v931_v32 }
  0x24   : > { %860 = vmatmul.mubr.msk.bf16.gmra.mxu0 %vm293_vm0, %v272_v21 }
  0x25   : > { %863 = vmatprep.mubr.msk.bf16.mxu0 %vm293_vm0, %v273_v22  ;;  %876 = vmatpush3.bf16.msra.mxu0 %v929_v30 }
  0x26   : > { %877 = vmatprep.subr.bf16.mxu0 %v930_v31  ;;  %913 = vmatpush3.bf16.msra.mxu1 %v931_v32 }
  0x27   : > { %906 = vmatprep.subr.bf16.mxu1 %v932_v33 }
  0x29   : > { %878 = vmatpush3.bf16.msra.mxu0 %v930_v31 }
  0x2a   : > { %879 = vmatprep.subr.bf16.mxu0 %v931_v32  ;;  %914 = vmatpush3.bf16.msra.mxu1 %v932_v33 }
  0x2c   : > { %864 = vmatmul.mubr.msk.bf16.gmra.mxu0 %vm293_vm0, %v274_v25 }
  0x2d   : > { %880 = vmatpush3.bf16.msra.mxu0 %v931_v32 }
  0x2e   : > { %881 = vmatprep.subr.bf16.mxu0 %v932_v33 }
  0x31   : > { %882 = vmatpush3.bf16.msra.mxu0 %v932_v33 }
  0xd4   : > { %v853_v35 = vpop.f32.mrf.mxu0 }
  0xd5   : > { %v1081_v36 = vadd.f32 %v853_v35, %v1078_v34 }
  0xd6   : > { %v352_v37 = vpop.f32.mrf.mxu0 }
  0xd7   : > { %v417_v38 = vmul.f32 %v1081_v36, %v1081_v36  ;;  %v1086_v39 = vadd.f32 %v1078_v34, %v352_v37 }
  0xd8   : > { %v854_v40 = vpop.f32.mrf.mxu0 }
  0xd9   : > { %v433_v41 = vmul.f32 %v417_v38, %v1081_v36  ;;  %v415_v42 = vmul.f32 %v1086_v39, %v1086_v39  ;;  %v1092_v43 = vadd.f32 %v854_v40, %v1078_v34 }
  0xda   : > { %v355_v44 = vpop.f32.mrf.mxu0 }
  0xdb   : > { %v449_v45 = vmul.f32 0.044715, %v433_v41  ;;  %v431_v46 = vmul.f32 %v415_v42, %v1086_v39  ;;  %v418_v47 = vmul.f32 %v1092_v43, %v1092_v43  ;;  %v1098_v48 = vadd.f32 %v1078_v34, %v355_v44 }
  0xdc   : > { %v857_v49 = vpop.f32.mrf.mxu0 }
  0xdd   : > { %v465_v50 = vadd.f32 %v449_v45, %v1081_v36  ;;  %v447_v51 = vmul.f32 0.044715, %v431_v46  ;;  %v434_v52 = vmul.f32 %v418_v47, %v1092_v43  ;;  %v416_v53 = vmul.f32 %v1098_v48, %v1098_v48 }
  0xde   : > { %v1105_v54 = vadd.f32 %v857_v49, %v1078_v34  ;;  %v368_v55 = vpop.f32.mrf.mxu0 }
  0xdf   : > { %v481_v56 = vmul.f32 0.7978846, %v465_v50  ;;  %v463_v57 = vadd.f32 %v447_v51, %v1086_v39  ;;  %v450_v58 = vmul.f32 0.044715, %v434_v52  ;;  %v432_v59 = vmul.f32 %v416_v53, %v1098_v48 }
  0xe0   : > { %v421_v60 = vmul.f32 %v1105_v54, %v1105_v54  ;;  %v1112_v61 = vadd.f32 %v1078_v34, %v368_v55  ;;  %v858_v62 = vpop.f32.mrf.mxu0 }
  0xe1   : > { %933 = vtanh.f32 %v481_v56  ;;  %v479_v63 = vmul.f32 0.7978846, %v463_v57  ;;  %v466_v0 = vadd.f32 %v450_v58, %v1092_v43  ;;  %v448_v1 = vmul.f32 0.044715, %v432_v59 }
  0xe2   : > { %v437_v2 = vmul.f32 %v421_v60, %v1105_v54  ;;  %v419_v3 = vmul.f32 %v1112_v61, %v1112_v61  ;;  %v1119_v4 = vadd.f32 %v858_v62, %v1078_v34  ;;  %v371_v5 = vpop.f32.mrf.mxu0 }
  0xe3   : > { %v482_v6 = vmul.f32 0.7978846, %v466_v0  ;;  %v464_v7 = vadd.f32 %v448_v1, %v1098_v48  ;;  %v1123_v8 = vadd.f32 %v1078_v34, %v371_v5  ;;  %935 = vtanh.f32 %v479_v63 }
  0xe4   : > { %v453_v9 = vmul.f32 0.044715, %v437_v2  ;;  %v435_v10 = vmul.f32 %v419_v3, %v1112_v61  ;;  %v422_v11 = vmul.f32 %v1119_v4, %v1119_v4  ;;  %v861_v12 = vpop.f32.mrf.mxu0 }
  0xe5   : > { %937 = vtanh.f32 %v482_v6  ;;  %v480_v13 = vmul.f32 0.7978846, %v464_v7  ;;  %v420_v14 = vmul.f32 %v1123_v8, %v1123_v8  ;;  %v1131_v15 = vadd.f32 %v861_v12, %v1078_v34 }
  0xe6   : > { %v469_v16 = vadd.f32 %v453_v9, %v1105_v54  ;;  %v451_v17 = vmul.f32 0.044715, %v435_v10  ;;  %v438_v18 = vmul.f32 %v422_v11, %v1119_v4  ;;  %v384_v19 = vpop.f32.mrf.mxu0 }
  0xe7   : > { %939 = vtanh.f32 %v480_v13  ;;  %v436_v20 = vmul.f32 %v420_v14, %v1123_v8  ;;  %v425_v21 = vmul.f32 %v1131_v15, %v1131_v15  ;;  %v1139_v22 = vadd.f32 %v1078_v34, %v384_v19 }
  0xe8   : > { %v485_v23 = vmul.f32 0.7978846, %v469_v16  ;;  %v467_v24 = vadd.f32 %v451_v17, %v1112_v61  ;;  %v454_v25 = vmul.f32 0.044715, %v438_v18  ;;  %v862_v26 = vpop.f32.mrf.mxu0 }
  0xe9   : > { %v452_v27 = vmul.f32 0.044715, %v436_v20  ;;  %v441_v28 = vmul.f32 %v425_v21, %v1131_v15  ;;  %v423_v29 = vmul.f32 %v1139_v22, %v1139_v22  ;;  %v1146_v30 = vadd.f32 %v862_v26, %v1078_v34 }
  0xea   : > { %941 = vtanh.f32 %v485_v23  ;;  %v470_v31 = vadd.f32 %v454_v25, %v1119_v4  ;;  %v387_v32 = vpop.f32.mrf.mxu0  ;;  %v483_v33 = vmul.f32 0.7978846, %v467_v24 }
  0xeb   : > { %v468_v35 = vadd.f32 %v452_v27, %v1123_v8  ;;  %v457_v37 = vmul.f32 0.044715, %v441_v28  ;;  %v439_v38 = vmul.f32 %v423_v29, %v1139_v22  ;;  %v426_v40 = vmul.f32 %v1146_v30, %v1146_v30 }
  0xec   : > { %v486_v41 = vmul.f32 0.7978846, %v470_v31  ;;  %v1154_v42 = vadd.f32 %v1078_v34, %v387_v32  ;;  %v865_v44 = vpop.f32.mrf.mxu0  ;;  %943 = vtanh.f32 %v483_v33 }
  0xed   : > { %v473_v45 = vadd.f32 %v457_v37, %v1131_v15  ;;  %v455_v46 = vmul.f32 0.044715, %v439_v38  ;;  %v442_v47 = vmul.f32 %v426_v40, %v1146_v30  ;;  %v1159_v49 = vadd.f32 %v865_v44, %v1078_v34 }
  0xee   : > { %v934_v50 = vpop.eup %933  ;;  %945 = vtanh.f32 %v486_v41  ;;  %v424_v51 = vmul.f32 %v1154_v42, %v1154_v42  ;;  %v400_v52 = vpop.f32.mrf.mxu0  ;;  %v484_v53 = vmul.f32 0.7978846, %v468_v35 }
  0xef   : > { %v513_v55 = vadd.f32 1.0, %v934_v50  ;;  %v489_v56 = vmul.f32 0.7978846, %v473_v45  ;;  %v471_v57 = vadd.f32 %v455_v46, %v1139_v22  ;;  %v458_v58 = vmul.f32 0.044715, %v442_v47 }
  0xf0   : > { %v440_v59 = vmul.f32 %v424_v51, %v1154_v42  ;;  %v429_v60 = vmul.f32 %v1159_v49, %v1159_v49  ;;  %v1168_v62 = vadd.f32 %v1078_v34, %v400_v52  ;;  %v866_v63 = vpop.f32.mrf.mxu0  ;;  %947 = vtanh.f32 %v484_v53  ;;  %v936_v0 = vpop.eup %935 }
  0xf1   : > { %949 = vtanh.f32 %v489_v56  ;;  %v487_v1 = vmul.f32 0.7978846, %v471_v57  ;;  %v474_v2 = vadd.f32 %v458_v58, %v1146_v30  ;;  %v1175_v9 = vadd.f32 %v866_v63, %v1078_v34 }
  0xf2   : > { %v938_v3 = vpop.eup %937  ;;  %v456_v5 = vmul.f32 0.044715, %v440_v59  ;;  %v445_v6 = vmul.f32 %v429_v60, %v1159_v49  ;;  %v427_v7 = vmul.f32 %v1168_v62, %v1168_v62  ;;  %v403_v10 = vpop.f32.mrf.mxu0  ;;  %v529_v11 = vmul.f32 0.5, %v513_v55 }
  0xf3   : > { %v514_v12 = vadd.f32 1.0, %v938_v3  ;;  %951 = vtanh.f32 %v487_v1  ;;  %v490_v13 = vmul.f32 0.7978846, %v474_v2  ;;  %v430_v19 = vmul.f32 %v1175_v9, %v1175_v9 }
  0xf4   : > { %v940_v14 = vpop.eup %939  ;;  %v472_v16 = vadd.f32 %v456_v5, %v1154_v42  ;;  %v461_v17 = vmul.f32 0.044715, %v445_v6  ;;  %v443_v18 = vmul.f32 %v427_v7, %v1168_v62  ;;  %v1182_v21 = vadd.f32 %v1078_v34, %v403_v10 }
  0xf5   : > { %v530_v20 = vmul.f32 0.5, %v514_v12  ;;  %953 = vtanh.f32 %v490_v13  ;;  %v511_v23 = vadd.f32 1.0, %v936_v0  ;;  %v446_v27 = vmul.f32 %v430_v19, %v1175_v9 }
  0xf6   : > { %v488_v24 = vmul.f32 0.7978846, %v472_v16  ;;  %v477_v25 = vadd.f32 %v461_v17, %v1159_v49  ;;  %v459_v26 = vmul.f32 0.044715, %v443_v18  ;;  %v428_v29 = vmul.f32 %v1182_v21, %v1182_v21 }
  0xf7   : > { %v942_v28 = vpop.eup %941  ;;  %v512_v31 = vadd.f32 1.0, %v940_v14  ;;  %v527_v32 = vmul.f32 0.5, %v511_v23  ;;  %v462_v37 = vmul.f32 0.044715, %v446_v27  ;;  %v545_v38 = vmul.f32 %v529_v11, %v1081_v36 }
  0xf8   : > { %955 = vtanh.f32 %v488_v24  ;;  %v493_v33 = vmul.f32 0.7978846, %v477_v25  ;;  %v475_v35 = vadd.f32 %v459_v26, %v1168_v62  ;;  %v546_v40 = vmul.f32 %v530_v20, %v1092_v43 }
  0xf9   : > { %v944_v34 = vpop.eup %943  ;;  %v444_v41 = vmul.f32 %v428_v29, %v1182_v21  ;;  %v528_v44 = vmul.f32 0.5, %v512_v31  ;;  %v478_v46 = vadd.f32 %v462_v37, %v1175_v9  ;;  %v543_v47 = vmul.f32 %v527_v32, %v1086_v39 }
  0xfa   : > { %v491_v45 = vmul.f32 0.7978846, %v475_v35  ;;  %v515_v50 = vadd.f32 1.0, %v944_v34  ;;  %957 = vtanh.f32 %v493_v33  ;;  %v517_v55 = vadd.f32 1.0, %v942_v28 }
  0xfb   : > { %v946_v51 = vpop.eup %945  ;;  %v460_v52 = vmul.f32 0.044715, %v444_v41  ;;  %v544_v53 = vmul.f32 %v528_v44, %v1098_v48  ;;  %v494_v56 = vmul.f32 0.7978846, %v478_v46  ;;  %v560_v43 = vpack.c.bf16 %v546_v40, %v545_v38 }
  0xfc   : > { %959 = vtanh.f32 %v491_v45  ;;  %v518_v36 = vadd.f32 1.0, %v946_v51  ;;  %v531_v0 = vmul.f32 0.5, %v515_v50  ;;  %v533_v2 = vmul.f32 0.5, %v517_v55 }
  0xfd   : > { %v948_v57 = vpop.eup %947  ;;  %v476_v58 = vadd.f32 %v460_v52, %v1182_v21  ;;  %v559_v59 = vpack.c.bf16 %v544_v53, %v543_v47  ;;  %961 = vtanh.f32 %v494_v56  ;;  %v810_v47 = vld [vmem:[%s1257_s4] ss:$0 sm:$0xff] }
  0xfe   : > { %v950_v60 = vpop.eup %949  ;;  %v516_v63 = vadd.f32 1.0, %v948_v57  ;;  %v534_v39 = vmul.f32 0.5, %v518_v36  ;;  %v547_v7 = vmul.f32 %v531_v0, %v1112_v61  ;;  %v549_v12 = vmul.f32 %v533_v2, %v1105_v54 }
  0xff   : > { %v492_v1 = vmul.f32 0.7978846, %v476_v58  ;;  %883 = vmatprep.mubr.bf16.mxu0 %v559_v59  ;;  %v521_v13 = vadd.f32 1.0, %v950_v60 }
 0x100   : > { %v952_v3 = vpop.eup %951  ;;  %884 = vmatmul.mubr.bf16.vlgmr.msra.gmra.mxu0 %v560_v43  ;;  %v532_v48 = vmul.f32 0.5, %v516_v63  ;;  %v550_v5 = vmul.f32 %v534_v39, %v1119_v4 }
 0x101   : > { %963 = vtanh.f32 %v492_v1  ;;  %v519_v11 = vadd.f32 1.0, %v952_v3  ;;  %v537_v24 = vmul.f32 0.5, %v521_v13 }
 0x102   : > { %v954_v6 = vpop.eup %953  ;;  %v548_v10 = vmul.f32 %v532_v48, %v1123_v8  ;;  %v562_v18 = vpack.c.bf16 %v550_v5, %v549_v12 }
 0x103   : > { %v522_v14 = vadd.f32 1.0, %v954_v6  ;;  %v535_v23 = vmul.f32 0.5, %v519_v11  ;;  %v553_v28 = vmul.f32 %v537_v24, %v1131_v15 }
 0x104   : > { %v561_v16 = vpack.c.bf16 %v548_v10, %v547_v7 }
 0x105   : > { %v956_v17 = vpop.eup %955  ;;  %v538_v19 = vmul.f32 0.5, %v522_v14  ;;  %v551_v8 = vmul.f32 %v535_v23, %v1139_v22 }
 0x106   : > { %887 = vmatprep.mubr.bf16.mxu1 %v561_v16  ;;  %v520_v20 = vadd.f32 1.0, %v956_v17 }
 0x107   : > { %888 = vmatmul.mubr.bf16.vlgmr.msra.gmra.mxu1 %v562_v18  ;;  %v958_v4 = vpop.eup %957  ;;  %v554_v61 = vmul.f32 %v538_v19, %v1146_v30 }
 0x108   : > { %v536_v25 = vmul.f32 0.5, %v520_v20  ;;  %v525_v32 = vadd.f32 1.0, %v958_v4 }
 0x109   : > { %v960_v26 = vpop.eup %959  ;;  %v564_v35 = vpack.c.bf16 %v554_v61, %v553_v28 }
 0x10a   : > { %v552_v54 = vmul.f32 %v536_v25, %v1154_v42  ;;  %v962_v27 = vpop.eup %961  ;;  %v523_v29 = vadd.f32 1.0, %v960_v26  ;;  %v541_v30 = vmul.f32 0.5, %v525_v32 }
 0x10b   : > { %v526_v33 = vadd.f32 1.0, %v962_v27 }
 0x10c   : > { %v563_v31 = vpack.c.bf16 %v552_v54, %v551_v8  ;;  %v539_v40 = vmul.f32 0.5, %v523_v29  ;;  %v557_v44 = vmul.f32 %v541_v30, %v1159_v49 }
 0x10d   : > { %v542_v34 = vmul.f32 0.5, %v526_v33 }
 0x10e   : > { %v964_v37 = vpop.eup %963  ;;  %891 = vmatprep.mubr.bf16.mxu1 %v563_v31  ;;  %v555_v42 = vmul.f32 %v539_v40, %v1168_v62 }
 0x10f   : > { %892 = vmatmul.mubr.bf16.gmra.mxu1 %v564_v35  ;;  %v524_v38 = vadd.f32 1.0, %v964_v37  ;;  %v558_v22 = vmul.f32 %v542_v34, %v1175_v9 }
 0x111   : > { %v540_v41 = vmul.f32 0.5, %v524_v38  ;;  %v566_v46 = vpack.c.bf16 %v558_v22, %v557_v44 }
 0x113   : > { %v556_v15 = vmul.f32 %v540_v41, %v1182_v21 }
 0x115   : > { %v565_v45 = vpack.c.bf16 %v556_v15, %v555_v42 }
 0x117   : > { %895 = vmatprep.mubr.bf16.mxu1 %v565_v45 }
 0x118   : > { %896 = vmatmul.mubr.bf16.gmra.mxu1 %v566_v46 }
 0x1c0   : > { %v885_v49 = vpop.f32.mrf.mxu0 }
 0x1c1   : > { %v664_v62 = vadd.f32 %v885_v49, %v810_v47 }
 0x1c2   : > { %v655_v9 = vpop.f32.mrf.mxu0 }
 0x1c3   : > { %720 = vst.msk [vmem:[%s1216_s29 + $0x10] sm:$0xff] %vm293_vm0, %v664_v62  ;;  %v656_v21 = vadd.f32 %v810_v47, %v655_v9 }
 0x1c4   : > { %v886_v50 = vpop.f32.mrf.mxu0 }
 0x1c5   : > { %718 = vst.msk [vmem:[%s1216_s29] sm:$0xff] %vm293_vm0, %v656_v21  ;;  %v667_v51 = vadd.f32 %v886_v50, %v810_v47 }
 0x1c6   : > { %v658_v52 = vpop.f32.mrf.mxu0 }
 0x1c7   : > { %721 = vst.msk [vmem:[%s1216_s29 + $0x18] sm:$0xff] %vm293_vm0, %v667_v51  ;;  %v659_v53 = vadd.f32 %v810_v47, %v658_v52  ;;  %v889_v55 = vpop.f32.mrf.mxu1 }
 0x1c8   : > { %v680_v56 = vadd.f32 %v889_v55, %v810_v47 }
 0x1c9   : > { %719 = vst.msk [vmem:[%s1216_s29 + $0x8] sm:$0xff] %vm293_vm0, %v659_v53  ;;  %v671_v36 = vpop.f32.mrf.mxu1 }
 0x1ca   : > { %724 = vst.msk [vmem:[%s1216_s29 + $0x30] sm:$0xff] %vm293_vm0, %v680_v56  ;;  %v672_v57 = vadd.f32 %v810_v47, %v671_v36 }
 0x1cb   : > { %v890_v43 = vpop.f32.mrf.mxu1 }
 0x1cc   : > { %722 = vst.msk [vmem:[%s1216_s29 + $0x20] sm:$0xff] %vm293_vm0, %v672_v57  ;;  %v683_v58 = vadd.f32 %v890_v43, %v810_v47 }
 0x1cd   : > { %v674_v59 = vpop.f32.mrf.mxu1 }
 0x1ce   : > { %725 = vst.msk [vmem:[%s1216_s29 + $0x38] sm:$0xff] %vm293_vm0, %v683_v58  ;;  %v675_v60 = vadd.f32 %v810_v47, %v674_v59 }
 0x1cf   : > { %v893_v63 = vpop.f32.mrf.mxu1 }
 0x1d0   : > { %723 = vst.msk [vmem:[%s1216_s29 + $0x28] sm:$0xff] %vm293_vm0, %v675_v60  ;;  %v696_v0 = vadd.f32 %v893_v63, %v810_v47 }
 0x1d1   : > { %v687_v39 = vpop.f32.mrf.mxu1 }
 0x1d2   : > { %728 = vst.msk [vmem:[%s1216_s29 + $0x50] sm:$0xff] %vm293_vm0, %v696_v0  ;;  %v688_v1 = vadd.f32 %v810_v47, %v687_v39 }
 0x1d3   : > { %v894_v2 = vpop.f32.mrf.mxu1 }
 0x1d4   : > { %726 = vst.msk [vmem:[%s1216_s29 + $0x40] sm:$0xff] %vm293_vm0, %v688_v1  ;;  %v699_v3 = vadd.f32 %v894_v2, %v810_v47 }
 0x1d5   : > { %v690_v48 = vpop.f32.mrf.mxu1 }
 0x1d6   : > { %729 = vst.msk [vmem:[%s1216_s29 + $0x58] sm:$0xff] %vm293_vm0, %v699_v3  ;;  %v691_v5 = vadd.f32 %v810_v47, %v690_v48 }
 0x1d8   : > { %727 = vst.msk [vmem:[%s1216_s29 + $0x48] sm:$0xff] %vm293_vm0, %v691_v5  ;;  %v897_v6 = vpop.f32.mrf.mxu1 }
 0x1d9   : > { %v712_v7 = vadd.f32 %v897_v6, %v810_v47 }
 0x1da   : > { %v703_v10 = vpop.f32.mrf.mxu1 }
 0x1db   : > { %732 = vst.msk [vmem:[%s1216_s29 + $0x70] sm:$0xff] %vm293_vm0, %v712_v7  ;;  %v704_v11 = vadd.f32 %v810_v47, %v703_v10 }
 0x1dc   : > { %v898_v12 = vpop.f32.mrf.mxu1 }
 0x1dd   : > { %730 = vst.msk [vmem:[%s1216_s29 + $0x60] sm:$0xff] %vm293_vm0, %v704_v11  ;;  %v715_v13 = vadd.f32 %v898_v12, %v810_v47 }
 0x1de   : > { %v706_v14 = vpop.f32.mrf.mxu1 }
 0x1df   : > { %733 = vst.msk [vmem:[%s1216_s29 + $0x78] sm:$0xff] %vm293_vm0, %v715_v13  ;;  %v707_v16 = vadd.f32 %v810_v47, %v706_v14 }
 0x1e1   : > { %731 = vst.msk [vmem:[%s1216_s29 + $0x68] sm:$0xff] %vm293_vm0, %v707_v16 }
 0x1e2 PF: > { %s15_s18 = sadd.s32 1, %s971_s18  }
 0x1e3   : > { %p12_p4 = scmp.ge.s32.totalorder %s15_s18, 4  }
 0x1e5   :  { %14 = sbr.rel (!%p12_p4) target bundleno = 1 (0x1), region = 70 }

</bundles_post_ra>
